<compile_context>
chip_gen: v5e
topology: v5e:2x2
jax: 0.10.0
libtpu: 0.0.40
codegen_flags: <defaults>
</compile_context>

<pallas_src>
from functools import partial

import jax
import jax.numpy as jnp
from jax.experimental import pallas as pl
from jax.experimental.pallas import tpu as pltpu


LANES = 128  # lane width: all channel-indexed tensors are zero-padded to this


# ----------------------------- in-kernel helpers -----------------------------

def _mish(x):
    # mish(x) = x * tanh(softplus(x)) = x * u / (u + 2),  u = e^x (e^x + 2)
    # exp clamp keeps the rational form exact in f32 for large x (no overflow / NaN).
    # The divide is an approximate EUP reciprocal + one Newton step: accuracy ~f32,
    # without the multi-op VPU divide sequence.
    e = jnp.exp(jnp.minimum(x, 20.0))
    u = e * (e + 2.0)
    v = u + 2.0
    r = pl.reciprocal(v, approx=True)
    r = r * (2.0 - v * r)                      # one Newton-Raphson refinement
    return x * (u * r)


def _group_norm(h, gamma, beta, m_ref, mt_ref, n_groups, c_real, eps=1e-5):
    """GroupNorm over a lane-padded [B, H, 128] block.

    Statistics are per (batch, group) over (horizon, channels-in-group).  Padding lanes
    (zero data, zero gamma/beta) stay exactly zero on both paths.
    """
    B, H, _ = h.shape
    cg = c_real // n_groups
    if cg == 1:
        # one channel per group (this config): group stats == per-channel stats over horizon
        mean = jnp.sum(h, axis=1, keepdims=True) * (1.0 / H)
        d = h - mean
        var = jnp.sum(d * d, axis=1, keepdims=True) * (1.0 / H)
        y = d * jax.lax.rsqrt(var + eps)
    else:
        # general case: per-group stats via tiny membership matmuls.
        # m: [128, G] one-hot group membership for real channels, zero rows for pad lanes.
        inv_n = 1.0 / float(H * cg)
        m, mt = m_ref[...], mt_ref[...]
        mean_c = jnp.dot(
            jnp.dot(jnp.sum(h, axis=1), m, preferred_element_type=jnp.float32) * inv_n,
            mt, preferred_element_type=jnp.float32)                       # [B, 128]
        d = h - mean_c[:, None, :]
        var_g = jnp.dot(jnp.sum(d * d, axis=1), m,
                        preferred_element_type=jnp.float32) * inv_n        # [B, G]
        y = d * jnp.dot(jax.lax.rsqrt(var_g + eps), mt,
                        preferred_element_type=jnp.float32)[:, None, :]
    return y * gamma + beta


# --------------------------------- kernel ------------------------------------

def residual_temporal_block_kernel(
    x_ref, t_ref,
    w1_ref, b1_ref, g1_ref, be1_ref,
    w2_ref, b2_ref, g2_ref, be2_ref,
    wt_ref, bt_ref, wr_ref, br_ref,
    m_ref, mt_ref,
    out_ref,
    xp_ref, midp_ref,
    *, ksize, n_groups, c_in, c_out,
):
    B, H, _ = x_ref.shape
    K = ksize
    pad = K // 2

    # Zero the padded scratch buffers once (single invocation, no grid).  Only interior rows
    # (and, for x, the first c_in lanes) are overwritten below, so the halo rows and the
    # padding lanes that the tap packing relies on stay zero.
    xp_ref[...] = jnp.zeros_like(xp_ref)
    midp_ref[...] = jnp.zeros_like(midp_ref)
    xp_ref[:, pad:pad + H, :c_in] = x_ref[...]

    def packed_im2col(src_ref, c):
        # a[b*H + h, k*c + j] = src[b, h + k, j]  for j < c; all other lanes zero.
        # Each tap is a lane rotation (XLU) of a window slice; the shifted lane ranges are
        # disjoint because src lanes >= c are zero, so a plain VPU sum packs them.
        a = src_ref[:, 0:H, :].reshape(B * H, LANES)
        for k in range(1, K):
            a = a + pltpu.roll(src_ref[:, k:k + H, :].reshape(B * H, LANES),
                               shift=k * c, axis=1)
        return a

    # ---- Conv1dBlock 0: k-tap "same" conv as ONE [B*H,128] x [128,128] MXU matmul ----
    a1 = packed_im2col(xp_ref, c_in)
    h1 = jnp.dot(a1, w1_ref[...], preferred_element_type=jnp.float32) + b1_ref[...]
    h1 = _mish(_group_norm(h1.reshape(B, H, LANES), g1_ref[...], be1_ref[...],
                           m_ref, mt_ref, n_groups, c_out))

    # ---- time MLP (whole batch at once), broadcast over the horizon ----
    temb = jnp.dot(_mish(t_ref[...]), wt_ref[...],
                   preferred_element_type=jnp.float32) + bt_ref[...]       # [B, 128]
    mid = h1 + temb[:, None, :]                                            # [B, H, 128]

    # mid's padding lanes (>= c_out) are exactly zero, so a full-lane (unmasked) store is
    # correct and keeps the second conv's tap packing uncontaminated.
    midp_ref[:, pad:pad + H, :] = mid

    # ---- Conv1dBlock 1 ----
    a2 = packed_im2col(midp_ref, c_out)
    h2 = jnp.dot(a2, w2_ref[...], preferred_element_type=jnp.float32) + b2_ref[...]
    h2 = _mish(_group_norm(h2.reshape(B, H, LANES), g2_ref[...], be2_ref[...],
                           m_ref, mt_ref, n_groups, c_out))

    # ---- residual 1x1 conv on the (unpadded) input, batch folded ----
    res = jnp.dot(x_ref[...].reshape(B * H, c_in), wr_ref[...],
                  preferred_element_type=jnp.float32) + br_ref[...]        # [B*H, 128]

    out_ref[...] = (h2 + res.reshape(B, H, LANES)).astype(out_ref.dtype)   # lane-dense store


# --------------------------------- wrapper -----------------------------------

@partial(jax.jit, static_argnames=("kernel_size", "n_groups"))
def residual_temporal_block(x_nch, t, params, *, kernel_size=5, n_groups=8):
    """x_nch: [B, inp_channels, horizon], t: [B, embed_dim] -> [B, out_channels, horizon]."""
    B, C_in, H = x_nch.shape
    K = kernel_size
    pad = K // 2
    C_out = params["w1"].shape[0]
    f32 = jnp.float32

    # This kernel packs all K taps of a conv into one 128-lane tile.
    # TODO(synk): at production channel counts (K*C > 128) fall back to a K-tile im2col with a
    # horizon-tiled grid and re-derive VMEM tiles per generation (64 MiB on v7x).
    assert K * C_in <= LANES and K * C_out <= LANES, "tap packing needs K*C <= 128"
    assert C_out <= LANES and C_out % n_groups == 0

    # ---- host-side weight prep (tiny tensors only; activations pass through untouched) ----
    # PyTorch Conv1d weight [C_out, C_in, K] -> packed im2col layout [128, 128]:
    #   row k*C_in + c, column o  <-  w[o, c, k]; unused rows and output lanes are zero.
    def conv_w_packed(w):
        co, ci, k = w.shape
        wk = jnp.transpose(w, (2, 1, 0)).reshape(k * ci, co)
        return jnp.pad(wk, ((0, LANES - k * ci), (0, LANES - co))).astype(f32)

    def lane_pad_cols(w2d):                                      # [r, C_out] -> [r, 128]
        return jnp.pad(w2d, ((0, 0), (0, LANES - w2d.shape[1]))).astype(f32)

    def row(v):                                                  # [C_out] -> [1, 128]
        return lane_pad_cols(v.reshape(1, -1))

    w1p = conv_w_packed(params["w1"])                            # [128, 128]
    w2p = conv_w_packed(params["w2"])                            # [128, 128]
    wtp = lane_pad_cols(jnp.transpose(params["wt"]))             # [E, 128]
    wrp = lane_pad_cols(jnp.transpose(params["wr"][:, :, 0]))    # [C_in, 128]

    # group-membership matrices for the general (channels-per-group > 1) GroupNorm path;
    # not even loaded by the kernel when channels-per-group == 1.
    cg = C_out // n_groups
    ch = jnp.arange(LANES)
    member = ((ch[:, None] // cg) == jnp.arange(n_groups)[None, :]) & (ch[:, None] < C_out)
    m = member.astype(f32)                                       # [128, G]
    mt = jnp.transpose(m)                                        # [G, 128]

    # layout glue: channels on the lane axis inside the kernel (NHC); horizon "same"-padding
    # happens inside the kernel via the VMEM scratch (no wrapper jnp.pad of activations).
    x_nhc = jnp.transpose(x_nch, (0, 2, 1)).astype(f32)          # [B, H, C_in]

    kernel = partial(residual_temporal_block_kernel,
                     ksize=K, n_groups=n_groups, c_in=C_in, c_out=C_out)
    vmem = pl.BlockSpec(memory_space=pltpu.MemorySpace.VMEM)

    out_pad = pl.pallas_call(
        kernel,
        out_shape=jax.ShapeDtypeStruct((B, H, LANES), f32),      # lane-dense output slab
        in_specs=[vmem] * 16,
        out_specs=vmem,
        scratch_shapes=[
            pltpu.VMEM((B, H + 2 * pad, LANES), f32),            # zero-padded x window source
            pltpu.VMEM((B, H + 2 * pad, LANES), f32),            # zero-padded mid window source
        ],
    )(x_nhc, t.astype(f32),
      w1p, row(params["b1"]), row(params["g1"]), row(params["be1"]),
      w2p, row(params["b2"]), row(params["g2"]), row(params["be2"]),
      wtp, row(params["bt"]), wrp, row(params["br"]),
      m, mt)

    # slice away the padding lanes where it fuses with the NHC -> NCH transpose
    return jnp.transpose(out_pad[:, :, :C_out], (0, 2, 1))       # [B, C_out, H]


# ----------------------------- pure-JAX reference ----------------------------

def reference(x_nch, t, params, kernel_size=5, n_groups=8, eps=1e-5):
    K = kernel_size
    pad = K // 2
    mish = lambda v: v * jnp.tanh(jnp.log1p(jnp.exp(v)))

    def conv1d(x, w, b):              # x [B, C_in, H], w [C_out, C_in, K], b [C_out]
        B, C_in, H = x.shape
        xp = jnp.pad(x, ((0, 0), (0, 0), (pad, pad)))
        out = jnp.zeros((B, w.shape[0], H), jnp.float32) + b[None, :, None]
        for k in range(K):
            out = out + jnp.einsum("bch,oc->boh", xp[:, :, k:k + H], w[:, :, k])
        return out

    def gn(x, gamma, beta):           # x [B, C, H]
        B, C, H = x.shape
        xg = x.reshape(B, n_groups, C // n_groups, H)
        mean = xg.mean(axis=(2, 3), keepdims=True)
        var = ((xg - mean) ** 2).mean(axis=(2, 3), keepdims=True)
        y = ((xg - mean) / jnp.sqrt(var + eps)).reshape(B, C, H)
        return y * gamma[None, :, None] + beta[None, :, None]

    x = x_nch.astype(jnp.float32)
    h1 = mish(gn(conv1d(x, params["w1"], params["b1"]), params["g1"], params["be1"]))
    temb = mish(t) @ params["wt"].T + params["bt"]            # [B, C_out]
    mid = h1 + temb[:, :, None]
    h2 = mish(gn(conv1d(mid, params["w2"], params["b2"]), params["g2"], params["be2"]))
    res = jnp.einsum("bch,oc->boh", x, params["wr"][:, :, 0]) + params["br"][None, :, None]
    return h2 + res


# ----------------------------------- main ------------------------------------

if __name__ == "__main__":
    B, C_IN, C_OUT, H, E, K, G = 2, 4, 8, 16, 16, 5, 8

    key = jax.random.PRNGKey(0)
    ks = jax.random.split(key, 16)
    f32 = jnp.float32
    # Parameters stored in native PyTorch shapes (Conv1d: [C_out, C_in, K], Linear: [out, in]).
    params = {
        "w1": 0.1 * jax.random.normal(ks[0], (C_OUT, C_IN, K), f32),
        "b1": 0.1 * jax.random.normal(ks[1], (C_OUT,), f32),
        "g1": 1.0 + 0.1 * jax.random.normal(ks[2], (C_OUT,), f32),
        "be1": 0.1 * jax.random.normal(ks[3], (C_OUT,), f32),
        "w2": 0.1 * jax.random.normal(ks[4], (C_OUT, C_OUT, K), f32),
        "b2": 0.1 * jax.random.normal(ks[5], (C_OUT,), f32),
        "g2": 1.0 + 0.1 * jax.random.normal(ks[6], (C_OUT,), f32),
        "be2": 0.1 * jax.random.normal(ks[7], (C_OUT,), f32),
        "wt": 0.1 * jax.random.normal(ks[8], (C_OUT, E), f32),
        "bt": 0.1 * jax.random.normal(ks[9], (C_OUT,), f32),
        "wr": 0.1 * jax.random.normal(ks[10], (C_OUT, C_IN, 1), f32),
        "br": 0.1 * jax.random.normal(ks[11], (C_OUT,), f32),
    }

    x = jax.random.normal(ks[12], (B, C_IN, H), f32)   # PyTorch layout: [batch, inp_channels, horizon]
    t = jax.random.normal(ks[13], (B, E), f32)         # [batch, embed_dim]

    out = jax.block_until_ready(
        residual_temporal_block(x, t, params, kernel_size=K, n_groups=G))
    ref = jax.block_until_ready(reference(x, t, params, kernel_size=K, n_groups=G))

    assert out.shape == (B, C_OUT, H), out.shape
    err = float(jnp.max(jnp.abs(out - ref)))
    assert err < 2e-3, err

    print("KERNEL_OK")
</pallas_src>

<mosaic_0001>
module attributes {stable_mosaic.version = 11 : i64} {
  func.func @residual_temporal_block_kernel(%arg0: memref<2x16x4xf32, #tpu.memory_space<vmem>>, %arg1: memref<2x16xf32, #tpu.memory_space<vmem>>, %arg2: memref<128x128xf32, #tpu.memory_space<vmem>>, %arg3: memref<1x128xf32, #tpu.memory_space<vmem>>, %arg4: memref<1x128xf32, #tpu.memory_space<vmem>>, %arg5: memref<1x128xf32, #tpu.memory_space<vmem>>, %arg6: memref<128x128xf32, #tpu.memory_space<vmem>>, %arg7: memref<1x128xf32, #tpu.memory_space<vmem>>, %arg8: memref<1x128xf32, #tpu.memory_space<vmem>>, %arg9: memref<1x128xf32, #tpu.memory_space<vmem>>, %arg10: memref<16x128xf32, #tpu.memory_space<vmem>>, %arg11: memref<1x128xf32, #tpu.memory_space<vmem>>, %arg12: memref<4x128xf32, #tpu.memory_space<vmem>>, %arg13: memref<1x128xf32, #tpu.memory_space<vmem>>, %arg14: memref<128x8xf32, #tpu.memory_space<vmem>>, %arg15: memref<8x128xf32, #tpu.memory_space<vmem>>, %arg16: memref<2x16x128xf32, #tpu.memory_space<vmem>>, %arg17: memref<2x20x128xf32, #tpu.memory_space<vmem>>, %arg18: memref<2x20x128xf32, #tpu.memory_space<vmem>>) attributes {dimension_semantics = [], scalar_prefetch = 0 : i64, scratch_operands = 2 : i64, tpu.core_type = #tpu.core_type<tc>} {
    %cst = arith.constant 0.000000e+00 : f32
    %0 = vector.broadcast %cst : f32 to vector<2x20x128xf32>
    %c0 = arith.constant 0 : index
    %c0_0 = arith.constant 0 : index
    %c0_1 = arith.constant 0 : index
    %1 = vector.load %arg17[%c0, %c0_0, %c0_1] : memref<2x20x128xf32, #tpu.memory_space<vmem>>, vector<2x20x128xf32>
    tpu.vector_store %arg17[%c0, %c0_0, %c0_1], %0 {strides = array<i32>} : memref<2x20x128xf32, #tpu.memory_space<vmem>>, vector<2x20x128xf32>,
    %cst_2 = arith.constant 0.000000e+00 : f32
    %2 = vector.broadcast %cst_2 : f32 to vector<2x20x128xf32>
    %c0_3 = arith.constant 0 : index
    %c0_4 = arith.constant 0 : index
    %c0_5 = arith.constant 0 : index
    %3 = vector.load %arg18[%c0_3, %c0_4, %c0_5] : memref<2x20x128xf32, #tpu.memory_space<vmem>>, vector<2x20x128xf32>
    tpu.vector_store %arg18[%c0_3, %c0_4, %c0_5], %2 {strides = array<i32>} : memref<2x20x128xf32, #tpu.memory_space<vmem>>, vector<2x20x128xf32>,
    %c0_6 = arith.constant 0 : index
    %c0_7 = arith.constant 0 : index
    %c0_8 = arith.constant 0 : index
    %4 = vector.load %arg0[%c0_6, %c0_7, %c0_8] : memref<2x16x4xf32, #tpu.memory_space<vmem>>, vector<2x16x4xf32>
    %c0_9 = arith.constant 0 : index
    %c2 = arith.constant 2 : index
    %c0_10 = arith.constant 0 : index
    %5 = vector.load %arg17[%c0_9, %c2, %c0_10] : memref<2x20x128xf32, #tpu.memory_space<vmem>>, vector<2x16x4xf32>
    tpu.vector_store %arg17[%c0_9, %c2, %c0_10], %4 {strides = array<i32>} : memref<2x20x128xf32, #tpu.memory_space<vmem>>, vector<2x16x4xf32>,
    %c0_11 = arith.constant 0 : index
    %c0_12 = arith.constant 0 : index
    %c0_13 = arith.constant 0 : index
    %6 = vector.load %arg17[%c0_11, %c0_12, %c0_13] : memref<2x20x128xf32, #tpu.memory_space<vmem>>, vector<2x16x128xf32>
    %7 = vector.shape_cast %6 : vector<2x16x128xf32> to vector<32x128xf32>
    %c0_14 = arith.constant 0 : index
    %c1 = arith.constant 1 : index
    %c0_15 = arith.constant 0 : index
    %8 = vector.load %arg17[%c0_14, %c1, %c0_15] : memref<2x20x128xf32, #tpu.memory_space<vmem>>, vector<2x16x128xf32>
    %9 = vector.shape_cast %8 : vector<2x16x128xf32> to vector<32x128xf32>
    %c4_i32 = arith.constant 4 : i32
    %10 = tpu.dynamic_rotate %9 by %c4_i32 dim 1 : vector<32x128xf32>, i32 -> vector<32x128xf32>
    %11 = arith.addf %7, %10 : vector<32x128xf32>
    %c0_16 = arith.constant 0 : index
    %c2_17 = arith.constant 2 : index
    %c0_18 = arith.constant 0 : index
    %12 = vector.load %arg17[%c0_16, %c2_17, %c0_18] : memref<2x20x128xf32, #tpu.memory_space<vmem>>, vector<2x16x128xf32>
    %13 = vector.shape_cast %12 : vector<2x16x128xf32> to vector<32x128xf32>
    %c8_i32 = arith.constant 8 : i32
    %14 = tpu.dynamic_rotate %13 by %c8_i32 dim 1 : vector<32x128xf32>, i32 -> vector<32x128xf32>
    %15 = arith.addf %11, %14 : vector<32x128xf32>
    %c0_19 = arith.constant 0 : index
    %c3 = arith.constant 3 : index
    %c0_20 = arith.constant 0 : index
    %16 = vector.load %arg17[%c0_19, %c3, %c0_20] : memref<2x20x128xf32, #tpu.memory_space<vmem>>, vector<2x16x128xf32>
    %17 = vector.shape_cast %16 : vector<2x16x128xf32> to vector<32x128xf32>
    %c12_i32 = arith.constant 12 : i32
    %18 = tpu.dynamic_rotate %17 by %c12_i32 dim 1 : vector<32x128xf32>, i32 -> vector<32x128xf32>
    %19 = arith.addf %15, %18 : vector<32x128xf32>
    %c0_21 = arith.constant 0 : index
    %c4 = arith.constant 4 : index
    %c0_22 = arith.constant 0 : index
    %20 = vector.load %arg17[%c0_21, %c4, %c0_22] : memref<2x20x128xf32, #tpu.memory_space<vmem>>, vector<2x16x128xf32>
    %21 = vector.shape_cast %20 : vector<2x16x128xf32> to vector<32x128xf32>
    %c16_i32 = arith.constant 16 : i32
    %22 = tpu.dynamic_rotate %21 by %c16_i32 dim 1 : vector<32x128xf32>, i32 -> vector<32x128xf32>
    %23 = arith.addf %19, %22 : vector<32x128xf32>
    %c0_23 = arith.constant 0 : index
    %c0_24 = arith.constant 0 : index
    %24 = vector.load %arg2[%c0_23, %c0_24] : memref<128x128xf32, #tpu.memory_space<vmem>>, vector<128x128xf32>
    %cst_25 = arith.constant dense<0.000000e+00> : vector<32x128xf32>
    %25 = tpu.matmul %23, %24, %cst_25 {dimension_numbers = #tpu.dot_dimension_numbers<[1], [0], [0], [1], [0, 0, 1, 1], [], []>} : vector<32x128xf32>, vector<128x128xf32>, vector<32x128xf32> -> vector<32x128xf32>
    %c0_26 = arith.constant 0 : index
    %c0_27 = arith.constant 0 : index
    %26 = vector.load %arg3[%c0_26, %c0_27] : memref<1x128xf32, #tpu.memory_space<vmem>>, vector<1x128xf32>
    %27 = vector.broadcast %26 : vector<1x128xf32> to vector<32x128xf32>
    %28 = arith.addf %25, %27 : vector<32x128xf32>
    %29 = vector.shape_cast %28 : vector<32x128xf32> to vector<2x16x128xf32>
    %c0_28 = arith.constant 0 : index
    %c0_29 = arith.constant 0 : index
    %30 = vector.load %arg4[%c0_28, %c0_29] : memref<1x128xf32, #tpu.memory_space<vmem>>, vector<1x128xf32>
    %c0_30 = arith.constant 0 : index
    %c0_31 = arith.constant 0 : index
    %31 = vector.load %arg5[%c0_30, %c0_31] : memref<1x128xf32, #tpu.memory_space<vmem>>, vector<1x128xf32>
    %cst_32 = arith.constant dense<0.000000e+00> : vector<2x128xf32>
    %32 = vector.multi_reduction <add>, %29, %cst_32 [1] : vector<2x16x128xf32> to vector<2x128xf32>
    %33 = vector.shape_cast %32 : vector<2x128xf32> to vector<2x1x128xf32>
    %cst_33 = arith.constant 6.250000e-02 : f32
    %34 = vector.broadcast %cst_33 : f32 to vector<2x1x128xf32>
    %35 = arith.mulf %33, %34 : vector<2x1x128xf32>
    %36 = vector.broadcast %35 : vector<2x1x128xf32> to vector<2x16x128xf32>
    %37 = arith.subf %29, %36 : vector<2x16x128xf32>
    %38 = arith.mulf %37, %37 : vector<2x16x128xf32>
    %cst_34 = arith.constant dense<0.000000e+00> : vector<2x128xf32>
    %39 = vector.multi_reduction <add>, %38, %cst_34 [1] : vector<2x16x128xf32> to vector<2x128xf32>
    %40 = vector.shape_cast %39 : vector<2x128xf32> to vector<2x1x128xf32>
    %cst_35 = arith.constant 6.250000e-02 : f32
    %41 = vector.broadcast %cst_35 : f32 to vector<2x1x128xf32>
    %42 = arith.mulf %40, %41 : vector<2x1x128xf32>
    %cst_36 = arith.constant 9.99999974E-6 : f32
    %43 = vector.broadcast %cst_36 : f32 to vector<2x1x128xf32>
    %44 = arith.addf %42, %43 : vector<2x1x128xf32>
    %45 = math.rsqrt %44 : vector<2x1x128xf32>
    %46 = vector.broadcast %45 : vector<2x1x128xf32> to vector<2x16x128xf32>
    %47 = arith.mulf %37, %46 : vector<2x16x128xf32>
    %48 = vector.shape_cast %30 : vector<1x128xf32> to vector<1x1x128xf32>
    %49 = vector.broadcast %48 : vector<1x1x128xf32> to vector<2x16x128xf32>
    %50 = arith.mulf %47, %49 : vector<2x16x128xf32>
    %51 = vector.shape_cast %31 : vector<1x128xf32> to vector<1x1x128xf32>
    %52 = vector.broadcast %51 : vector<1x1x128xf32> to vector<2x16x128xf32>
    %53 = arith.addf %50, %52 : vector<2x16x128xf32>
    %cst_37 = arith.constant 2.000000e+01 : f32
    %54 = vector.broadcast %cst_37 : f32 to vector<2x16x128xf32>
    %55 = arith.minimumf %53, %54 : vector<2x16x128xf32>
    %56 = math.exp %55 : vector<2x16x128xf32>
    %cst_38 = arith.constant 2.000000e+00 : f32
    %57 = vector.broadcast %cst_38 : f32 to vector<2x16x128xf32>
    %58 = arith.addf %56, %57 : vector<2x16x128xf32>
    %59 = arith.mulf %56, %58 : vector<2x16x128xf32>
    %cst_39 = arith.constant 2.000000e+00 : f32
    %60 = vector.broadcast %cst_39 : f32 to vector<2x16x128xf32>
    %61 = arith.addf %59, %60 : vector<2x16x128xf32>
    %62 = tpu.reciprocal %61 {approx = true} : vector<2x16x128xf32> -> vector<2x16x128xf32>
    %63 = arith.mulf %61, %62 : vector<2x16x128xf32>
    %cst_40 = arith.constant 2.000000e+00 : f32
    %64 = vector.broadcast %cst_40 : f32 to vector<2x16x128xf32>
    %65 = arith.subf %64, %63 : vector<2x16x128xf32>
    %66 = arith.mulf %62, %65 : vector<2x16x128xf32>
    %67 = arith.mulf %59, %66 : vector<2x16x128xf32>
    %68 = arith.mulf %53, %67 : vector<2x16x128xf32>
    %c0_41 = arith.constant 0 : index
    %c0_42 = arith.constant 0 : index
    %69 = vector.load %arg1[%c0_41, %c0_42] : memref<2x16xf32, #tpu.memory_space<vmem>>, vector<2x16xf32>
    %cst_43 = arith.constant 2.000000e+01 : f32
    %70 = vector.broadcast %cst_43 : f32 to vector<2x16xf32>
    %71 = arith.minimumf %69, %70 : vector<2x16xf32>
    %72 = math.exp %71 : vector<2x16xf32>
    %cst_44 = arith.constant 2.000000e+00 : f32
    %73 = vector.broadcast %cst_44 : f32 to vector<2x16xf32>
    %74 = arith.addf %72, %73 : vector<2x16xf32>
    %75 = arith.mulf %72, %74 : vector<2x16xf32>
    %cst_45 = arith.constant 2.000000e+00 : f32
    %76 = vector.broadcast %cst_45 : f32 to vector<2x16xf32>
    %77 = arith.addf %75, %76 : vector<2x16xf32>
    %78 = tpu.reciprocal %77 {approx = true} : vector<2x16xf32> -> vector<2x16xf32>
    %79 = arith.mulf %77, %78 : vector<2x16xf32>
    %cst_46 = arith.constant 2.000000e+00 : f32
    %80 = vector.broadcast %cst_46 : f32 to vector<2x16xf32>
    %81 = arith.subf %80, %79 : vector<2x16xf32>
    %82 = arith.mulf %78, %81 : vector<2x16xf32>
    %83 = arith.mulf %75, %82 : vector<2x16xf32>
    %84 = arith.mulf %69, %83 : vector<2x16xf32>
    %c0_47 = arith.constant 0 : index
    %c0_48 = arith.constant 0 : index
    %85 = vector.load %arg10[%c0_47, %c0_48] : memref<16x128xf32, #tpu.memory_space<vmem>>, vector<16x128xf32>
    %cst_49 = arith.constant dense<0.000000e+00> : vector<2x128xf32>
    %86 = tpu.matmul %84, %85, %cst_49 {dimension_numbers = #tpu.dot_dimension_numbers<[1], [0], [0], [1], [0, 0, 1, 1], [], []>} : vector<2x16xf32>, vector<16x128xf32>, vector<2x128xf32> -> vector<2x128xf32>
    %c0_50 = arith.constant 0 : index
    %c0_51 = arith.constant 0 : index
    %87 = vector.load %arg11[%c0_50, %c0_51] : memref<1x128xf32, #tpu.memory_space<vmem>>, vector<1x128xf32>
    %88 = vector.broadcast %87 : vector<1x128xf32> to vector<2x128xf32>
    %89 = arith.addf %86, %88 : vector<2x128xf32>
    %90 = vector.shape_cast %89 : vector<2x128xf32> to vector<2x1x128xf32>
    %91 = vector.broadcast %90 : vector<2x1x128xf32> to vector<2x16x128xf32>
    %92 = arith.addf %68, %91 : vector<2x16x128xf32>
    %c0_52 = arith.constant 0 : index
    %c2_53 = arith.constant 2 : index
    %c0_54 = arith.constant 0 : index
    %93 = vector.load %arg18[%c0_52, %c2_53, %c0_54] : memref<2x20x128xf32, #tpu.memory_space<vmem>>, vector<2x16x128xf32>
    tpu.vector_store %arg18[%c0_52, %c2_53, %c0_54], %92 {strides = array<i32>} : memref<2x20x128xf32, #tpu.memory_space<vmem>>, vector<2x16x128xf32>,
    %c0_55 = arith.constant 0 : index
    %c0_56 = arith.constant 0 : index
    %c0_57 = arith.constant 0 : index
    %94 = vector.load %arg18[%c0_55, %c0_56, %c0_57] : memref<2x20x128xf32, #tpu.memory_space<vmem>>, vector<2x16x128xf32>
    %95 = vector.shape_cast %94 : vector<2x16x128xf32> to vector<32x128xf32>
    %c0_58 = arith.constant 0 : index
    %c1_59 = arith.constant 1 : index
    %c0_60 = arith.constant 0 : index
    %96 = vector.load %arg18[%c0_58, %c1_59, %c0_60] : memref<2x20x128xf32, #tpu.memory_space<vmem>>, vector<2x16x128xf32>
    %97 = vector.shape_cast %96 : vector<2x16x128xf32> to vector<32x128xf32>
    %c8_i32_61 = arith.constant 8 : i32
    %98 = tpu.dynamic_rotate %97 by %c8_i32_61 dim 1 : vector<32x128xf32>, i32 -> vector<32x128xf32>
    %99 = arith.addf %95, %98 : vector<32x128xf32>
    %c0_62 = arith.constant 0 : index
    %c2_63 = arith.constant 2 : index
    %c0_64 = arith.constant 0 : index
    %100 = vector.load %arg18[%c0_62, %c2_63, %c0_64] : memref<2x20x128xf32, #tpu.memory_space<vmem>>, vector<2x16x128xf32>
    %101 = vector.shape_cast %100 : vector<2x16x128xf32> to vector<32x128xf32>
    %c16_i32_65 = arith.constant 16 : i32
    %102 = tpu.dynamic_rotate %101 by %c16_i32_65 dim 1 : vector<32x128xf32>, i32 -> vector<32x128xf32>
    %103 = arith.addf %99, %102 : vector<32x128xf32>
    %c0_66 = arith.constant 0 : index
    %c3_67 = arith.constant 3 : index
    %c0_68 = arith.constant 0 : index
    %104 = vector.load %arg18[%c0_66, %c3_67, %c0_68] : memref<2x20x128xf32, #tpu.memory_space<vmem>>, vector<2x16x128xf32>
    %105 = vector.shape_cast %104 : vector<2x16x128xf32> to vector<32x128xf32>
    %c24_i32 = arith.constant 24 : i32
    %106 = tpu.dynamic_rotate %105 by %c24_i32 dim 1 : vector<32x128xf32>, i32 -> vector<32x128xf32>
    %107 = arith.addf %103, %106 : vector<32x128xf32>
    %c0_69 = arith.constant 0 : index
    %c4_70 = arith.constant 4 : index
    %c0_71 = arith.constant 0 : index
    %108 = vector.load %arg18[%c0_69, %c4_70, %c0_71] : memref<2x20x128xf32, #tpu.memory_space<vmem>>, vector<2x16x128xf32>
    %109 = vector.shape_cast %108 : vector<2x16x128xf32> to vector<32x128xf32>
    %c32_i32 = arith.constant 32 : i32
    %110 = tpu.dynamic_rotate %109 by %c32_i32 dim 1 : vector<32x128xf32>, i32 -> vector<32x128xf32>
    %111 = arith.addf %107, %110 : vector<32x128xf32>
    %c0_72 = arith.constant 0 : index
    %c0_73 = arith.constant 0 : index
    %112 = vector.load %arg6[%c0_72, %c0_73] : memref<128x128xf32, #tpu.memory_space<vmem>>, vector<128x128xf32>
    %cst_74 = arith.constant dense<0.000000e+00> : vector<32x128xf32>
    %113 = tpu.matmul %111, %112, %cst_74 {dimension_numbers = #tpu.dot_dimension_numbers<[1], [0], [0], [1], [0, 0, 1, 1], [], []>} : vector<32x128xf32>, vector<128x128xf32>, vector<32x128xf32> -> vector<32x128xf32>
    %c0_75 = arith.constant 0 : index
    %c0_76 = arith.constant 0 : index
    %114 = vector.load %arg7[%c0_75, %c0_76] : memref<1x128xf32, #tpu.memory_space<vmem>>, vector<1x128xf32>
    %115 = vector.broadcast %114 : vector<1x128xf32> to vector<32x128xf32>
    %116 = arith.addf %113, %115 : vector<32x128xf32>
    %117 = vector.shape_cast %116 : vector<32x128xf32> to vector<2x16x128xf32>
    %c0_77 = arith.constant 0 : index
    %c0_78 = arith.constant 0 : index
    %118 = vector.load %arg8[%c0_77, %c0_78] : memref<1x128xf32, #tpu.memory_space<vmem>>, vector<1x128xf32>
    %c0_79 = arith.constant 0 : index
    %c0_80 = arith.constant 0 : index
    %119 = vector.load %arg9[%c0_79, %c0_80] : memref<1x128xf32, #tpu.memory_space<vmem>>, vector<1x128xf32>
    %cst_81 = arith.constant dense<0.000000e+00> : vector<2x128xf32>
    %120 = vector.multi_reduction <add>, %117, %cst_81 [1] : vector<2x16x128xf32> to vector<2x128xf32>
    %121 = vector.shape_cast %120 : vector<2x128xf32> to vector<2x1x128xf32>
    %cst_82 = arith.constant 6.250000e-02 : f32
    %122 = vector.broadcast %cst_82 : f32 to vector<2x1x128xf32>
    %123 = arith.mulf %121, %122 : vector<2x1x128xf32>
    %124 = vector.broadcast %123 : vector<2x1x128xf32> to vector<2x16x128xf32>
    %125 = arith.subf %117, %124 : vector<2x16x128xf32>
    %126 = arith.mulf %125, %125 : vector<2x16x128xf32>
    %cst_83 = arith.constant dense<0.000000e+00> : vector<2x128xf32>
    %127 = vector.multi_reduction <add>, %126, %cst_83 [1] : vector<2x16x128xf32> to vector<2x128xf32>
    %128 = vector.shape_cast %127 : vector<2x128xf32> to vector<2x1x128xf32>
    %cst_84 = arith.constant 6.250000e-02 : f32
    %129 = vector.broadcast %cst_84 : f32 to vector<2x1x128xf32>
    %130 = arith.mulf %128, %129 : vector<2x1x128xf32>
    %cst_85 = arith.constant 9.99999974E-6 : f32
    %131 = vector.broadcast %cst_85 : f32 to vector<2x1x128xf32>
    %132 = arith.addf %130, %131 : vector<2x1x128xf32>
    %133 = math.rsqrt %132 : vector<2x1x128xf32>
    %134 = vector.broadcast %133 : vector<2x1x128xf32> to vector<2x16x128xf32>
    %135 = arith.mulf %125, %134 : vector<2x16x128xf32>
    %136 = vector.shape_cast %118 : vector<1x128xf32> to vector<1x1x128xf32>
    %137 = vector.broadcast %136 : vector<1x1x128xf32> to vector<2x16x128xf32>
    %138 = arith.mulf %135, %137 : vector<2x16x128xf32>
    %139 = vector.shape_cast %119 : vector<1x128xf32> to vector<1x1x128xf32>
    %140 = vector.broadcast %139 : vector<1x1x128xf32> to vector<2x16x128xf32>
    %141 = arith.addf %138, %140 : vector<2x16x128xf32>
    %cst_86 = arith.constant 2.000000e+01 : f32
    %142 = vector.broadcast %cst_86 : f32 to vector<2x16x128xf32>
    %143 = arith.minimumf %141, %142 : vector<2x16x128xf32>
    %144 = math.exp %143 : vector<2x16x128xf32>
    %cst_87 = arith.constant 2.000000e+00 : f32
    %145 = vector.broadcast %cst_87 : f32 to vector<2x16x128xf32>
    %146 = arith.addf %144, %145 : vector<2x16x128xf32>
    %147 = arith.mulf %144, %146 : vector<2x16x128xf32>
    %cst_88 = arith.constant 2.000000e+00 : f32
    %148 = vector.broadcast %cst_88 : f32 to vector<2x16x128xf32>
    %149 = arith.addf %147, %148 : vector<2x16x128xf32>
    %150 = tpu.reciprocal %149 {approx = true} : vector<2x16x128xf32> -> vector<2x16x128xf32>
    %151 = arith.mulf %149, %150 : vector<2x16x128xf32>
    %cst_89 = arith.constant 2.000000e+00 : f32
    %152 = vector.broadcast %cst_89 : f32 to vector<2x16x128xf32>
    %153 = arith.subf %152, %151 : vector<2x16x128xf32>
    %154 = arith.mulf %150, %153 : vector<2x16x128xf32>
    %155 = arith.mulf %147, %154 : vector<2x16x128xf32>
    %156 = arith.mulf %141, %155 : vector<2x16x128xf32>
    %c0_90 = arith.constant 0 : index
    %c0_91 = arith.constant 0 : index
    %c0_92 = arith.constant 0 : index
    %157 = vector.load %arg0[%c0_90, %c0_91, %c0_92] : memref<2x16x4xf32, #tpu.memory_space<vmem>>, vector<2x16x4xf32>
    %158 = vector.shape_cast %157 : vector<2x16x4xf32> to vector<32x4xf32>
    %c0_93 = arith.constant 0 : index
    %c0_94 = arith.constant 0 : index
    %159 = vector.load %arg12[%c0_93, %c0_94] : memref<4x128xf32, #tpu.memory_space<vmem>>, vector<4x128xf32>
    %cst_95 = arith.constant dense<0.000000e+00> : vector<32x128xf32>
    %160 = tpu.matmul %158, %159, %cst_95 {dimension_numbers = #tpu.dot_dimension_numbers<[1], [0], [0], [1], [0, 0, 1, 1], [], []>} : vector<32x4xf32>, vector<4x128xf32>, vector<32x128xf32> -> vector<32x128xf32>
    %c0_96 = arith.constant 0 : index
    %c0_97 = arith.constant 0 : index
    %161 = vector.load %arg13[%c0_96, %c0_97] : memref<1x128xf32, #tpu.memory_space<vmem>>, vector<1x128xf32>
    %162 = vector.broadcast %161 : vector<1x128xf32> to vector<32x128xf32>
    %163 = arith.addf %160, %162 : vector<32x128xf32>
    %164 = vector.shape_cast %163 : vector<32x128xf32> to vector<2x16x128xf32>
    %165 = arith.addf %156, %164 : vector<2x16x128xf32>
    %c0_98 = arith.constant 0 : index
    %c0_99 = arith.constant 0 : index
    %c0_100 = arith.constant 0 : index
    %166 = vector.load %arg16[%c0_98, %c0_99, %c0_100] : memref<2x16x128xf32, #tpu.memory_space<vmem>>, vector<2x16x128xf32>
    tpu.vector_store %arg16[%c0_98, %c0_99, %c0_100], %165 {strides = array<i32>} : memref<2x16x128xf32, #tpu.memory_space<vmem>>, vector<2x16x128xf32>,
    return
  }
}

</mosaic_0001>

<bundles_post_ra>
// kernel: residual_temporal_block.1
= control target key start
LH: loop header
LB: loop body
LE: loop exit
PB: predicated region body
PF: predicated region fallthrough
CT: control target
= control target key end

     0   :  { %v772_v0 = vmov 0.0   ;;  %vm69_vm0 = vcmask 31744   ;;  %s773_s22 = smov 4   ;;  %s774_s25 = smov 12   ;;  %vm340_vm1 = vcmask 130048   ;;  %vm646_vm8 = vcmask 1043456   ;;  %s1076_s0 = inlined_call_operand.vmem [shape: f32[2,16,4], index: 0, kind: input, shape index: {}]   ;;  %s1077_s14 = inlined_call_operand.vmem [shape: f32[128,8], index: 14, kind: input, shape index: {}]   ;;  %s1078_s15 = inlined_call_operand.vmem [shape: f32[8,128], index: 15, kind: input, shape index: {}]   ;;  %s1079_s2 = inlined_call_operand.vmem [shape: f32[128,128], index: 2, kind: input, shape index: {}]   ;;  %s1080_s3 = inlined_call_operand.vmem [shape: f32[1,128], index: 3, kind: input, shape index: {}]   ;;  %s1081_s10 = inlined_call_operand.vmem [shape: f32[16,128], index: 10, kind: input, shape index: {}]   ;;  %s1082_s1 = inlined_call_operand.vmem [shape: f32[2,16], index: 1, kind: input, shape index: {}]   ;;  %s1083_s4 = inlined_call_operand.vmem [shape: f32[1,128], index: 4, kind: input, shape index: {}]   ;;  %s1084_s5 = inlined_call_operand.vmem [shape: f32[1,128], index: 5, kind: input, shape index: {}]   ;;  %s1085_s11 = inlined_call_operand.vmem [shape: f32[1,128], index: 11, kind: input, shape index: {}]   ;;  %s1086_s7 = inlined_call_operand.vmem [shape: f32[1,128], index: 7, kind: input, shape index: {}]   ;;  %s1087_s6 = inlined_call_operand.vmem [shape: f32[128,128], index: 6, kind: input, shape index: {}]   ;;  %s1088_s12 = inlined_call_operand.vmem [shape: f32[4,128], index: 12, kind: input, shape index: {}]   ;;  %s1089_s8 = inlined_call_operand.vmem [shape: f32[1,128], index: 8, kind: input, shape index: {}]   ;;  %s1090_s9 = inlined_call_operand.vmem [shape: f32[1,128], index: 9, kind: input, shape index: {}]   ;;  %s1091_s13 = inlined_call_operand.vmem [shape: f32[1,128], index: 13, kind: input, shape index: {}]   ;;  %s1092_s16 = inlined_call_operand.vmem [shape: f32[2,16,128], index: 16, kind: output, shape index: {}]  }
   0x1   :  { %1094 = sst [smem:[#allocation4_spill]] %s1076_s0  ;;  %53 = vst [vmem:[#allocation2] sm:$0xff] %v772_v0  ;;  %s775_s28 = smov 8   ;;  %v157_v11 = vld [vmem:[%s1079_s2 + $0x78] sm:$0xff]  ;;  %v156_v12 = vld [vmem:[%s1079_s2 + $0x70] sm:$0xff]  ;;  %v155_v13 = vld [vmem:[%s1079_s2 + $0x68] sm:$0xff] }
   0x2   :  { %s1095_s15 = sld [smem:[#allocation4_spill]]  ;;  %54 = vst [vmem:[#allocation2 + $0x8] sm:$0xff] %v772_v0  ;;  %s776_s18 = smov 16   ;;  %162 = vmatpush.msra.mxu0 %v157_v11  ;;  %697 = vmatpush.msra.mxu1 %v157_v11  ;;  %v154_v14 = vld [vmem:[%s1079_s2 + $0x60] sm:$0xff]  ;;  %v153_v17 = vld [vmem:[%s1079_s2 + $0x58] sm:$0xff]  ;;  %v152_v19 = vld [vmem:[%s1079_s2 + $0x50] sm:$0xff] }
   0x3   :  { %55 = vst [vmem:[#allocation2 + $0x10] sm:$0xf] %v772_v0  ;;  %v151_v20 = vld [vmem:[%s1079_s2 + $0x48] sm:$0xff]  ;;  %v150_v21 = vld [vmem:[%s1079_s2 + $0x40] sm:$0xff]  ;;  %v149_v24 = vld [vmem:[%s1079_s2 + $0x38] sm:$0xff]  ;;  %s778_s24 = smov 32  }
   0x4   :  { %56 = vst [vmem:[#allocation2 + $0x18] sm:$0xff] %v772_v0  ;;  %163 = vmatpush.msra.mxu0 %v156_v12  ;;  %698 = vmatpush.msra.mxu1 %v156_v12  ;;  %v148_v30 = vld [vmem:[%s1079_s2 + $0x30] sm:$0xff]  ;;  %v147_v31 = vld [vmem:[%s1079_s2 + $0x28] sm:$0xff]  ;;  %v146_v32 = vld [vmem:[%s1079_s2 + $0x20] sm:$0xff] }
   0x5   :  { %57 = vst [vmem:[#allocation2 + $0x20] sm:$0xff] %v772_v0  ;;  %v145_v33 = vld [vmem:[%s1079_s2 + $0x18] sm:$0xff]  ;;  %v144_v34 = vld [vmem:[%s1079_s2 + $0x10] sm:$0xff]  ;;  %v143_v35 = vld [vmem:[%s1079_s2 + $0x8] sm:$0xff] }
   0x6   :  { %58 = vst [vmem:[#allocation2 + $0x28] sm:$0xf] %v772_v0  ;;  %164 = vmatpush.msra.mxu0 %v155_v13  ;;  %699 = vmatpush.msra.mxu1 %v155_v13  ;;  %v142_v36 = vld [vmem:[%s1079_s2] sm:$0xff]  ;;  %v335_v49 = vld [vmem:[%s1081_s10 + $0x8] sm:$0xff] }
   0x7   :  { %59 = vst [vmem:[#allocation3] sm:$0xff] %v772_v0  ;;  %v334_v50 = vld [vmem:[%s1081_s10] sm:$0xff] }
   0x8   :  { %v867_v1 = vld [vmem:[%s1095_s15] sm:$0xff]  ;;  %v872_v2 = vld [vmem:[%s1095_s15 + $0x8] sm:$0xff]  ;;  %60 = vst [vmem:[#allocation3 + $0x8] sm:$0xff] %v772_v0  ;;  %v882_v5 = vld [vmem:[%s1095_s15 + $0x10] sm:$0xff]  ;;  %165 = vmatpush.msra.mxu0 %v154_v14  ;;  %700 = vmatpush.msra.mxu1 %v154_v14 }
   0x9   :  { %70 = vst.msk [vmem:[#allocation2 + $0x2] sm:$0xff] %vm69_vm0, %v867_v1  ;;  %v888_v6 = vld [vmem:[%s1095_s15 + $0x18] sm:$0xff]  ;;  %v321_v51 = vld [vmem:[%s1082_s1] sm:$0x3] }
   0xa   :  { %71 = vst.msk [vmem:[#allocation2 + $0xa] sm:$0xff] %vm69_vm0, %v872_v2  ;;  %166 = vmatpush.msra.mxu0 %v153_v17  ;;  %701 = vmatpush.msra.mxu1 %v153_v17  ;;  %v322_v53 = vmin.f32 %v321_v51, 20.0 }
   0xb   :  { %61 = vst [vmem:[#allocation3 + $0x10] sm:$0xf] %v772_v0 }
   0xc   :  { %62 = vst [vmem:[#allocation3 + $0x18] sm:$0xff] %v772_v0  ;;  %167 = vmatpush.msra.mxu0 %v152_v19  ;;  %702 = vmatpush.msra.mxu1 %v152_v19  ;;  %v323_v55 = vmul.f32 1.442695, %v322_v53 }
   0xd   :  { %63 = vst [vmem:[#allocation3 + $0x20] sm:$0xff] %v772_v0 }
   0xe   :  { %64 = vst [vmem:[#allocation3 + $0x28] sm:$0xf] %v772_v0  ;;  %168 = vmatpush.msra.mxu0 %v151_v20  ;;  %703 = vmatpush.msra.mxu1 %v151_v20  ;;  %728 = vpow2.f32 %v323_v55 }
   0xf   :  { %72 = vst.msk [vmem:[#allocation2 + $0x1a] sm:$0xff] %vm69_vm0, %v882_v5 }
  0x10   :  { %v78_v3 = vld [vmem:[#allocation2 + $0x1] sm:$0xff]  ;;  %73 = vst.msk [vmem:[#allocation2 + $0x22] sm:$0xff] %vm69_vm0, %v888_v6  ;;  %169 = vmatpush.msra.mxu0 %v150_v21  ;;  %704 = vmatpush.msra.mxu1 %v150_v21 }
  0x11   :  { %v110_v4 = vld [vmem:[#allocation2 + $0x3] sm:$0xff]  ;;  %82 = vrot.lane.b32.xlu0 %v78_v3, %s773_s22  ;;  %v111_v15 = vld [vmem:[#allocation2 + $0xb] sm:$0xff] }
  0x12   :  { %114 = vrot.lane.b32.xlu1 %v110_v4, %s774_s25  ;;  %v79_v7 = vld [vmem:[#allocation2 + $0x9] sm:$0xff]  ;;  %170 = vmatpush.msra.mxu0 %v149_v24  ;;  %v74_v41 = vld [vmem:[#allocation2] sm:$0xff] }
  0x13   :  { %84 = vrot.lane.b32.xlu2 %v79_v7, %s773_s22  ;;  %v94_v8 = vld [vmem:[#allocation2 + $0x2] sm:$0xff]  ;;  %v95_v10 = vld [vmem:[#allocation2 + $0xa] sm:$0xff]  ;;  %705 = vmatpush.msra.mxu1 %v149_v24 }
  0x14   :  { %v126_v9 = vld [vmem:[#allocation2 + $0x4] sm:$0xff]  ;;  %v127_v16 = vld [vmem:[#allocation2 + $0xc] sm:$0xff]  ;;  %171 = vmatpush.msra.mxu0 %v148_v30  ;;  %v729_v61 = vpop.eup %728 }
  0x15   :  { %706 = vmatpush.msra.mxu1 %v148_v30  ;;  %v75_v43 = vld [vmem:[#allocation2 + $0x8] sm:$0xff]  ;;  %v325_v63 = vadd.f32 2.0, %v729_v61 }
  0x16   :  { %v80_v18 = vld [vmem:[#allocation2 + $0x19] sm:$0xff]  ;;  %172 = vmatpush.msra.mxu0 %v147_v31 }
  0x17   :  { %v81_v22 = vld [vmem:[#allocation2 + $0x21] sm:$0xff]  ;;  %707 = vmatpush.msra.mxu1 %v147_v31  ;;  %v76_v0 = vld [vmem:[#allocation2 + $0x18] sm:$0xff]  ;;  %v326_v4 = vmul.f32 %v729_v61, %v325_v63 }
  0x18   :  { %v96_v23 = vld [vmem:[#allocation2 + $0x1a] sm:$0xff]  ;;  %v97_v25 = vld [vmem:[#allocation2 + $0x22] sm:$0xff]  ;;  %173 = vmatpush.msra.mxu0 %v146_v32 }
  0x19   :  { %98 = vrot.lane.b32.xlu0 %v94_v8, %s775_s28  ;;  %v112_v26 = vld [vmem:[#allocation2 + $0x1b] sm:$0xff]  ;;  %v113_v27 = vld [vmem:[#allocation2 + $0x23] sm:$0xff]  ;;  %708 = vmatpush.msra.mxu1 %v146_v32 }
  0x1a   :  { %130 = vrot.lane.b32.xlu1 %v126_v9, %s776_s18  ;;  %v128_v28 = vld [vmem:[#allocation2 + $0x1c] sm:$0xff]  ;;  %v129_v29 = vld [vmem:[#allocation2 + $0x24] sm:$0xff]  ;;  %174 = vmatpush.msra.mxu0 %v145_v33  ;;  %v327_v9 = vadd.f32 2.0, %v326_v4 }
  0x1b   :  { %100 = vrot.lane.b32.xlu2 %v95_v10, %s775_s28  ;;  %709 = vmatpush.msra.mxu1 %v145_v33  ;;  %v77_v10 = vld [vmem:[#allocation2 + $0x20] sm:$0xff] }
  0x1c   :  { %175 = vmatpush.msra.mxu0 %v144_v34  ;;  %730 = vrcp.f32 %v327_v9 }
  0x1d   :  { %710 = vmatpush.msra.mxu1 %v144_v34 }
  0x1e   :  { %176 = vmatpush.msra.mxu0 %v143_v35 }
  0x1f   :  { %711 = vmatpush.msra.mxu1 %v143_v35 }
  0x20   :  { %177 = vmatpush.msra.mxu0 %v142_v36 }
  0x21   :  { %116 = vrot.lane.b32.xlu0 %v111_v15, %s774_s25  ;;  %712 = vmatpush.msra.mxu1 %v142_v36 }
  0x22   :  { %132 = vrot.lane.b32.xlu1 %v127_v16, %s776_s18  ;;  %v731_v16 = vpop.eup %730 }
  0x23   :  { %86 = vrot.lane.b32.xlu2 %v80_v18, %s773_s22  ;;  %358 = vmatpush.msrb.mxu1 %v335_v49  ;;  %v329_v19 = vmul.f32 %v731_v16, %v327_v9 }
  0x25   :  { %359 = vmatpush.msrb.mxu1 %v334_v50  ;;  %v330_v21 = vsub.f32 2.0, %v329_v19 }
  0x27   :  { %v331_v24 = vmul.f32 %v731_v16, %v330_v21 }
  0x29   :  { %88 = vrot.lane.b32.xlu0 %v81_v22, %s773_s22 }
  0x2a   :  { %102 = vrot.lane.b32.xlu1 %v96_v23, %s775_s28 }
  0x2b   :  { %104 = vrot.lane.b32.xlu2 %v97_v25, %s775_s28 }
  0x31   :  { %118 = vrot.lane.b32.xlu0 %v112_v26, %s774_s25  ;;  %v332_v26 = vmul.f32 %v331_v24, %v326_v4 }
  0x32   :  { %120 = vrot.lane.b32.xlu1 %v113_v27, %s774_s25 }
  0x33   :  { %134 = vrot.lane.b32.xlu2 %v128_v28, %s776_s18  ;;  %v333_v27 = vmul.f32 %v332_v26, %v321_v51 }
  0x39   :  { %136 = vrot.lane.b32.xlu0 %v129_v29, %s776_s18  ;;  %v720_v29 = vld [vmem:[%s1080_s3] ss:$0 sm:$0xff] }
  0x6d   :  { %v85_v37 = vpop.permute.xlu2 %84 }
  0x6e   :  { %v91_v47 = vadd.f32 %v85_v37, %v75_v43 }
  0x75   :  { %v101_v40 = vpop.permute.xlu2 %100 }
  0x76   :  { %v107_v56 = vadd.f32 %v101_v40, %v91_v47 }
  0x7d   :  { %v87_v52 = vpop.permute.xlu2 %86 }
  0x7e   :  { %v92_v8 = vadd.f32 %v87_v52, %v76_v0 }
  0x83   :  { %v83_v38 = vpop.permute.xlu0 %82 }
  0x84   :  { %v115_v39 = vpop.permute.xlu1 %114  ;;  %v90_v42 = vadd.f32 %v83_v38, %v74_v41 }
  0x85   :  { %v105_v62 = vpop.permute.xlu2 %104 }
  0x8b   :  { %v99_v44 = vpop.permute.xlu0 %98 }
  0x8c   :  { %v131_v45 = vpop.permute.xlu1 %130  ;;  %v106_v46 = vadd.f32 %v99_v44, %v90_v42 }
  0x8d   :  { %v135_v13 = vpop.permute.xlu2 %134 }
  0x8e   :  { %v122_v48 = vadd.f32 %v115_v39, %v106_v46 }
  0x90   :  { %v138_v54 = vadd.f32 %v131_v45, %v122_v48 }
  0x92   :  { %178 = vmatmul.f32.vlgmr.msra.gmra.mxu0 %v138_v54 }
  0x93   :  { %v117_v57 = vpop.permute.xlu0 %116 }
  0x94   :  { %v133_v58 = vpop.permute.xlu1 %132  ;;  %v123_v59 = vadd.f32 %v117_v57, %v107_v56 }
  0x96   :  { %v139_v60 = vadd.f32 %v133_v58, %v123_v59 }
  0x9a   :  { %181 = vmatmul.f32.gmra.mxu0 %v139_v60 }
  0x9b   :  { %v89_v3 = vpop.permute.xlu0 %88 }
  0x9c   :  { %v103_v7 = vpop.permute.xlu1 %102  ;;  %v93_v14 = vadd.f32 %v89_v3, %v77_v10 }
  0x9d   :  { %v108_v11 = vadd.f32 %v103_v7, %v92_v8 }
  0x9e   :  { %v109_v20 = vadd.f32 %v105_v62, %v93_v14 }
  0xa3   :  { %v119_v12 = vpop.permute.xlu0 %118 }
  0xa4   :  { %v124_v15 = vadd.f32 %v119_v12, %v108_v11  ;;  %v121_v18 = vpop.permute.xlu1 %120 }
  0xa5   :  { %v125_v22 = vadd.f32 %v121_v18, %v109_v20 }
  0xa6   :  { %v140_v17 = vadd.f32 %v135_v13, %v124_v15 }
  0xa8   :  { %184 = vmatmul.f32.gmra.mxu0 %v140_v17 }
  0xab   :  { %v137_v23 = vpop.permute.xlu0 %136 }
  0xac   :  { %v141_v25 = vadd.f32 %v137_v23, %v125_v22  ;;  %v721_v23 = vld [vmem:[%s1083_s4] ss:$0 sm:$0xff] }
  0xae   :  { %187 = vmatmul.f32.vlgmr.msra.gmra.mxu1 %v141_v25 }
  0xb6   :  { %691 = vmatmul.msk.f32.vlgmr.msrb.gmra.mxu1 %vm340_vm1, %v333_v27 }
 0x10f   :  { %v179_v28 = vpop.f32.mrf.mxu0 }
 0x110   :  { %v180_v31 = vadd.f32 %v720_v29, %v179_v28 }
 0x117   :  { %v182_v30 = vpop.f32.mrf.mxu0 }
 0x118   :  { %v183_v32 = vadd.f32 %v720_v29, %v182_v30 }
 0x11a   :  { %v193_v33 = vadd.f32 %v183_v32, %v180_v31 }
 0x11c   :  { %v194_v34 = vrot.slane %v193_v33, 4 }
 0x11e   :  { %v195_v35 = vadd.f32 %v194_v34, %v193_v33 }
 0x120   :  { %v196_v36 = vrot.slane %v195_v35, 2 }
 0x122   :  { %v197_v37 = vadd.f32 %v196_v36, %v195_v35 }
 0x124   :  { %v198_v38 = vrot.slane %v197_v37, 1 }
 0x125   :  { %v185_v41 = vpop.f32.mrf.mxu0 }
 0x126   :  { %v199_v39 = vadd.f32 %v198_v38, %v197_v37  ;;  %v186_v47 = vadd.f32 %v720_v29, %v185_v41 }
 0x128   :  { %v207_v40 = vmul.f32 0.0625, %v199_v39 }
 0x12a   :  { %v209_v42 = vsub.f32 %v180_v31, %v207_v40  ;;  %v210_v43 = vsub.f32 %v183_v32, %v207_v40 }
 0x12b   :  { %v188_v44 = vpop.f32.mrf.mxu1 }
 0x12c   :  { %v213_v45 = vmul.f32 %v209_v42, %v209_v42  ;;  %v214_v46 = vmul.f32 %v210_v43, %v210_v43  ;;  %v189_v48 = vadd.f32 %v720_v29, %v188_v44  ;;  %v722_v29 = vld [vmem:[%s1084_s5] ss:$0 sm:$0xff] }
 0x12e   :  { %v217_v49 = vadd.f32 %v214_v46, %v213_v45  ;;  %v200_v50 = vadd.f32 %v189_v48, %v186_v47 }
 0x130   :  { %v218_v51 = vrot.slane %v217_v49, 4  ;;  %v201_v52 = vrot.slane %v200_v50, 4 }
 0x132   :  { %v219_v53 = vadd.f32 %v218_v51, %v217_v49  ;;  %v202_v54 = vadd.f32 %v201_v52, %v200_v50 }
 0x134   :  { %v220_v55 = vrot.slane %v219_v53, 2  ;;  %v203_v56 = vrot.slane %v202_v54, 2 }
 0x136   :  { %v221_v57 = vadd.f32 %v220_v55, %v219_v53  ;;  %v204_v58 = vadd.f32 %v203_v56, %v202_v54 }
 0x138   :  { %v222_v59 = vrot.slane %v221_v57, 1  ;;  %v205_v60 = vrot.slane %v204_v58, 1 }
 0x13a   :  { %v223_v61 = vadd.f32 %v222_v59, %v221_v57  ;;  %v206_v62 = vadd.f32 %v205_v60, %v204_v58 }
 0x13c   :  { %v231_v63 = vmul.f32 0.0625, %v223_v61  ;;  %v208_v0 = vmul.f32 0.0625, %v206_v62 }
 0x13e   :  { %v233_v3 = vadd.f32 1e-05, %v231_v63  ;;  %v211_v4 = vsub.f32 %v186_v47, %v208_v0  ;;  %v212_v7 = vsub.f32 %v189_v48, %v208_v0  ;;  %v723_v63 = vld [vmem:[%s1085_s11] ss:$0 sm:$0xff]  ;;  %s777_s11 = smov 24  }
 0x140   :  { %732 = vrsqrt.f32 %v233_v3  ;;  %v215_v8 = vmul.f32 %v211_v4, %v211_v4  ;;  %v216_v9 = vmul.f32 %v212_v7, %v212_v7  ;;  %vm241_vm3 = vweird.f32 %v233_v3 }
 0x142   :  { %v224_v10 = vadd.f32 %v216_v9, %v215_v8 }
 0x144   :  { %v225_v11 = vrot.slane %v224_v10, 4 }
 0x146   :  { %v733_v12 = vpop.eup %732  ;;  %v226_v13 = vadd.f32 %v225_v11, %v224_v10 }
 0x147   :  { %v236_v14 = vmul.f32 %v733_v12, %v233_v3  ;;  %vm242_vm2 = vweird.f32 %v733_v12  ;;  %v361_v3 = vpop.f32.mrf.mxu1 }
 0x148   :  { %v227_v15 = vrot.slane %v226_v13, 2  ;;  %vm243_vm4 = vmor %vm241_vm3, %vm242_vm2  ;;  %v362_v10 = vadd.f32 %v723_v63, %v361_v3  ;;  %v455_v63 = vld [vmem:[%s1087_s6 + $0x48] sm:$0xff]  ;;  %v453_v3 = vld [vmem:[%s1087_s6 + $0x38] sm:$0xff] }
 0x149   :  { %v237_v16 = vmul.f32 %v733_v12, %v236_v14 }
 0x14a   :  { %v228_v17 = vadd.f32 %v227_v15, %v226_v13 }
 0x14b   :  { %v238_v18 = vmul.f32 0.5, %v237_v16  ;;  %v366_v16 = vperm.slane %v362_v10, 0 }
 0x14c   :  { %v229_v19 = vrot.slane %v228_v17, 1 }
 0x14d   :  { %v239_v20 = vsub.f32 1.5, %v238_v18 }
 0x14e   :  { %v230_v21 = vadd.f32 %v229_v19, %v228_v17 }
 0x14f   :  { %v240_v22 = vmul.f32 %v733_v12, %v239_v20 }
 0x150   :  { %v232_v24 = vmul.f32 0.0625, %v230_v21 }
 0x151   :  { %v244_v25 = vsel %vm243_vm4, %v733_v12, %v240_v22 }
 0x152   :  { %v255_v26 = vmul.f32 %v244_v25, %v209_v42  ;;  %v256_v27 = vmul.f32 %v244_v25, %v210_v43  ;;  %v234_v28 = vadd.f32 1e-05, %v232_v24 }
 0x154   :  { %v262_v30 = vmul.f32 %v721_v23, %v255_v26  ;;  %v263_v31 = vmul.f32 %v721_v23, %v256_v27  ;;  %734 = vrsqrt.f32 %v234_v28  ;;  %vm251_vm6 = vweird.f32 %v234_v28 }
 0x156   :  { %v269_v32 = vadd.f32 %v722_v29, %v262_v30  ;;  %v270_v33 = vadd.f32 %v722_v29, %v263_v31 }
 0x158   :  { %v273_v34 = vmin.f32 %v269_v32, 20.0  ;;  %v274_v35 = vmin.f32 %v270_v33, 20.0 }
 0x15a   :  { %v735_v36 = vpop.eup %734  ;;  %v277_v37 = vmul.f32 1.442695, %v273_v34  ;;  %v279_v38 = vmul.f32 1.442695, %v274_v35 }
 0x15b   :  { %v246_v39 = vmul.f32 %v735_v36, %v234_v28  ;;  %vm252_vm5 = vweird.f32 %v735_v36 }
 0x15c   :  { %736 = vpow2.f32 %v277_v37  ;;  %vm253_vm7 = vmor %vm251_vm6, %vm252_vm5 }
 0x15d   :  { %v247_v40 = vmul.f32 %v735_v36, %v246_v39  ;;  %738 = vpow2.f32 %v279_v38  ;;  %v365_v39 = vrot.slane %v362_v10, 1  ;;  %v448_v10 = vld [vmem:[%s1087_s6 + $0x10] sm:$0xff] }
 0x15f   :  { %v248_v41 = vmul.f32 0.5, %v247_v40 }
 0x161   :  { %v249_v42 = vsub.f32 1.5, %v248_v41 }
 0x162   :  { %v737_v43 = vpop.eup %736 }
 0x163   :  { %v739_v44 = vpop.eup %738  ;;  %v250_v45 = vmul.f32 %v735_v36, %v249_v42  ;;  %v285_v46 = vadd.f32 2.0, %v737_v43 }
 0x164   :  { %v286_v47 = vadd.f32 2.0, %v739_v44 }
 0x165   :  { %v254_v48 = vsel %vm253_vm7, %v735_v36, %v250_v45  ;;  %v289_v49 = vmul.f32 %v737_v43, %v285_v46  ;;  %v367_v45 = vperm.slane %v365_v39, 0 }
 0x166   :  { %v257_v50 = vmul.f32 %v254_v48, %v211_v4  ;;  %v258_v51 = vmul.f32 %v254_v48, %v212_v7  ;;  %v290_v52 = vmul.f32 %v739_v44, %v286_v47 }
 0x167   :  { %v293_v53 = vadd.f32 2.0, %v289_v49 }
 0x168   :  { %v264_v54 = vmul.f32 %v721_v23, %v257_v50  ;;  %v265_v55 = vmul.f32 %v721_v23, %v258_v51  ;;  %v294_v56 = vadd.f32 2.0, %v290_v52 }
 0x169   :  { %740 = vrcp.f32 %v293_v53 }
 0x16a   :  { %v272_v57 = vadd.f32 %v722_v29, %v265_v55  ;;  %v974_v58 = vadd.f32 %v722_v29, %v264_v54  ;;  %742 = vrcp.f32 %v294_v56 }
 0x16c   :  { %v276_v59 = vmin.f32 %v272_v57, 20.0  ;;  %v275_v60 = vmin.f32 %v974_v58, 20.0 }
 0x16e   :  { %v283_v61 = vmul.f32 1.442695, %v276_v59  ;;  %v281_v62 = vmul.f32 1.442695, %v275_v60  ;;  %v459_v59 = vld [vmem:[%s1087_s6 + $0x68] sm:$0xff]  ;;  %v458_v60 = vld [vmem:[%s1087_s6 + $0x60] sm:$0xff] }
 0x16f   :  { %v741_v0 = vpop.eup %740 }
 0x170   :  { %v743_v4 = vpop.eup %742  ;;  %744 = vpow2.f32 %v283_v61  ;;  %v301_v7 = vmul.f32 %v741_v0, %v293_v53  ;;  %v457_v61 = vld [vmem:[%s1087_s6 + $0x58] sm:$0xff] }
 0x171   :  { %746 = vpow2.f32 %v281_v62  ;;  %v302_v8 = vmul.f32 %v743_v4, %v294_v56  ;;  %v456_v62 = vld [vmem:[%s1087_s6 + $0x50] sm:$0xff] }
 0x172   :  { %v305_v9 = vsub.f32 2.0, %v301_v7  ;;  %v451_v7 = vld [vmem:[%s1087_s6 + $0x28] sm:$0xff] }
 0x173   :  { %v306_v11 = vsub.f32 2.0, %v302_v8  ;;  %v450_v8 = vld [vmem:[%s1087_s6 + $0x20] sm:$0xff] }
 0x174   :  { %v309_v12 = vmul.f32 %v741_v0, %v305_v9  ;;  %v454_v0 = vld [vmem:[%s1087_s6 + $0x40] sm:$0xff]  ;;  %v449_v9 = vld [vmem:[%s1087_s6 + $0x18] sm:$0xff] }
 0x175   :  { %v310_v13 = vmul.f32 %v743_v4, %v306_v11  ;;  %v452_v4 = vld [vmem:[%s1087_s6 + $0x30] sm:$0xff]  ;;  %v447_v11 = vld [vmem:[%s1087_s6 + $0x8] sm:$0xff] }
 0x176   :  { %v745_v14 = vpop.eup %744  ;;  %v313_v15 = vmul.f32 %v309_v12, %v289_v49  ;;  %v446_v12 = vld [vmem:[%s1087_s6] sm:$0xff] }
 0x177   :  { %v747_v17 = vpop.eup %746  ;;  %v288_v18 = vadd.f32 2.0, %v745_v14  ;;  %v314_v19 = vmul.f32 %v310_v13, %v290_v52 }
 0x178   :  { %v287_v20 = vadd.f32 2.0, %v747_v17  ;;  %v317_v21 = vmul.f32 %v313_v15, %v269_v32 }
 0x179   :  { %v292_v22 = vmul.f32 %v745_v14, %v288_v18  ;;  %v318_v23 = vmul.f32 %v314_v19, %v270_v33 }
 0x17a   :  { %v291_v24 = vmul.f32 %v747_v17, %v287_v20  ;;  %v370_v25 = vadd.f32 %v366_v16, %v317_v21 }
 0x17b   :  { %v296_v26 = vadd.f32 2.0, %v292_v22  ;;  %v371_v27 = vadd.f32 %v366_v16, %v318_v23  ;;  %v629_v23 = vld [vmem:[%s1088_s12] sm:$0xf] }
 0x17c   :  { %v295_v28 = vadd.f32 2.0, %v291_v24  ;;  %374 = vst [vmem:[#allocation3 + $0x2] sm:$0xff] %v370_v25  ;;  %402 = vrot.lane.b32.xlu2 %v370_v25, %s776_s18  ;;  %692 = vmatpush.msk.msra.mxu3 %vm646_vm8, %v629_v23 }
 0x17d   :  { %748 = vrcp.f32 %v296_v26  ;;  %375 = vst [vmem:[#allocation3 + $0xa] sm:$0xff] %v371_v27  ;;  %693 = vmatmul.msk.f32.vlgmr.msra.gmra.mxu3 %vm69_vm0, %v867_v1 }
 0x17e   :  { %750 = vrcp.f32 %v295_v28 }
 0x183   :  { %v749_v29 = vpop.eup %748  ;;  %v382_v30 = vld [vmem:[#allocation3 + $0x1] sm:$0xff] }
 0x184   :  { %v751_v31 = vpop.eup %750  ;;  %v304_v34 = vmul.f32 %v749_v29, %v296_v26  ;;  %v414_v35 = vld [vmem:[#allocation3 + $0x3] sm:$0xff]  ;;  %386 = vrot.lane.b32.xlu1 %v382_v30, %s775_s28  ;;  %v431_v46 = vld [vmem:[#allocation3 + $0xc] sm:$0xff] }
 0x185   :  { %v383_v32 = vld [vmem:[#allocation3 + $0x9] sm:$0xff]  ;;  %v303_v33 = vmul.f32 %v751_v31, %v295_v28  ;;  %418 = vrot.lane.b32.xlu0 %v414_v35, %s777_s11  ;;  %v378_v15 = vld [vmem:[#allocation3] sm:$0xff]  ;;  %694 = vmatmul.msk.f32.gmra.mxu3 %vm69_vm0, %v872_v2 }
 0x186   :  { %388 = vrot.lane.b32.xlu2 %v383_v32, %s775_s28  ;;  %v308_v36 = vsub.f32 2.0, %v304_v34  ;;  %v430_v43 = vld [vmem:[#allocation3 + $0x4] sm:$0xff] }
 0x187   :  { %v307_v37 = vsub.f32 2.0, %v303_v33  ;;  %v415_v50 = vld [vmem:[#allocation3 + $0xb] sm:$0xff] }
 0x188   :  { %v312_v38 = vmul.f32 %v749_v29, %v308_v36 }
 0x189   :  { %v311_v40 = vmul.f32 %v751_v31, %v307_v37 }
 0x18a   :  { %v316_v41 = vmul.f32 %v312_v38, %v292_v22 }
 0x18b   :  { %v315_v42 = vmul.f32 %v311_v40, %v291_v24  ;;  %v379_v24 = vld [vmem:[#allocation3 + $0x8] sm:$0xff] }
 0x18c   :  { %v320_v44 = vmul.f32 %v316_v41, %v272_v57  ;;  %434 = vrot.lane.b32.xlu1 %v430_v43, %s778_s24  ;;  %v461_v57 = vld [vmem:[%s1087_s6 + $0x78] sm:$0xff] }
 0x18d   :  { %v319_v47 = vmul.f32 %v315_v42, %v974_v58  ;;  %404 = vrot.lane.b32.xlu0 %v371_v27, %s776_s18  ;;  %v460_v58 = vld [vmem:[%s1087_s6 + $0x70] sm:$0xff]  ;;  %466 = vmatpush.msra.mxu2 %v461_v57 }
 0x18e   :  { %436 = vrot.lane.b32.xlu2 %v431_v46, %s778_s24  ;;  %v373_v48 = vadd.f32 %v367_v45, %v320_v44  ;;  %695 = vmatmul.msk.f32.gmra.mxu3 %vm69_vm0, %v882_v5  ;;  %v724_v5 = vld [vmem:[%s1086_s7] ss:$0 sm:$0xff] }
 0x18f   :  { %v372_v49 = vadd.f32 %v367_v45, %v319_v47  ;;  %467 = vmatpush.msra.mxu2 %v460_v58 }
 0x190   :  { %377 = vst [vmem:[#allocation3 + $0x22] sm:$0xff] %v373_v48 }
 0x191   :  { %376 = vst [vmem:[#allocation3 + $0x1a] sm:$0xff] %v372_v49  ;;  %468 = vmatpush.msra.mxu2 %v459_v59 }
 0x193   :  { %469 = vmatpush.msra.mxu2 %v458_v60 }
 0x194   :  { %420 = vrot.lane.b32.xlu1 %v415_v50, %s777_s11 }
 0x195   :  { %470 = vmatpush.msra.mxu2 %v457_v61 }
 0x196   :  { %696 = vmatmul.msk.f32.gmra.mxu3 %vm69_vm0, %v888_v6 }
 0x197   :  { %v417_v55 = vld [vmem:[#allocation3 + $0x23] sm:$0xff]  ;;  %471 = vmatpush.msra.mxu2 %v456_v62 }
 0x198   :  { %v384_v51 = vld [vmem:[#allocation3 + $0x19] sm:$0xff]  ;;  %v385_v54 = vld [vmem:[#allocation3 + $0x21] sm:$0xff] }
 0x199   :  { %v416_v52 = vld [vmem:[#allocation3 + $0x1b] sm:$0xff]  ;;  %390 = vrot.lane.b32.xlu0 %v384_v51, %s775_s28  ;;  %v433_v56 = vld [vmem:[#allocation3 + $0x24] sm:$0xff]  ;;  %472 = vmatpush.msra.mxu2 %v455_v63 }
 0x19a   :  { %422 = vrot.lane.b32.xlu2 %v416_v52, %s777_s11  ;;  %v432_v53 = vld [vmem:[#allocation3 + $0x1c] sm:$0xff] }
 0x19b   :  { %473 = vmatpush.msra.mxu2 %v454_v0  ;;  %v380_v35 = vld [vmem:[#allocation3 + $0x18] sm:$0xff]  ;;  %v381_v40 = vld [vmem:[#allocation3 + $0x20] sm:$0xff] }
 0x19c   :  { %406 = vrot.lane.b32.xlu1 %v372_v49, %s776_s18 }
 0x19d   :  { %474 = vmatpush.msra.mxu2 %v453_v3 }
 0x19f   :  { %475 = vmatpush.msra.mxu2 %v452_v4 }
 0x1a1   :  { %438 = vrot.lane.b32.xlu0 %v432_v53, %s778_s24  ;;  %476 = vmatpush.msra.mxu2 %v451_v7 }
 0x1a2   :  { %408 = vrot.lane.b32.xlu2 %v373_v48, %s776_s18 }
 0x1a3   :  { %477 = vmatpush.msra.mxu2 %v450_v8 }
 0x1a4   :  { %392 = vrot.lane.b32.xlu1 %v385_v54, %s775_s28 }
 0x1a5   :  { %478 = vmatpush.msra.mxu2 %v449_v9 }
 0x1a7   :  { %479 = vmatpush.msra.mxu2 %v448_v10 }
 0x1a9   :  { %424 = vrot.lane.b32.xlu0 %v417_v55, %s777_s11  ;;  %480 = vmatpush.msra.mxu2 %v447_v11 }
 0x1ab   :  { %481 = vmatpush.msra.mxu2 %v446_v12 }
 0x1ac   :  { %440 = vrot.lane.b32.xlu1 %v433_v56, %s778_s24 }
 0x1d6   :  { %v403_v13 = vpop.permute.xlu2 %402 }
 0x1e0   :  { %v389_v19 = vpop.permute.xlu2 %388 }
 0x1e1   :  { %v395_v26 = vadd.f32 %v389_v19, %v379_v24 }
 0x1e8   :  { %v437_v28 = vpop.permute.xlu2 %436 }
 0x1f4   :  { %v423_v33 = vpop.permute.xlu2 %422 }
 0x1f6   :  { %v387_v14 = vpop.permute.xlu1 %386 }
 0x1f7   :  { %v394_v16 = vadd.f32 %v387_v14, %v378_v15  ;;  %v419_v17 = vpop.permute.xlu0 %418 }
 0x1f9   :  { %v410_v18 = vadd.f32 %v403_v13, %v394_v16 }
 0x1fb   :  { %v426_v20 = vadd.f32 %v419_v17, %v410_v18 }
 0x1fc   :  { %v409_v43 = vpop.permute.xlu2 %408 }
 0x1fe   :  { %v435_v21 = vpop.permute.xlu1 %434 }
 0x1ff   :  { %v442_v22 = vadd.f32 %v435_v21, %v426_v20  ;;  %v405_v25 = vpop.permute.xlu0 %404 }
 0x200   :  { %v411_v27 = vadd.f32 %v405_v25, %v395_v26 }
 0x201   :  { %482 = vmatmul.f32.vlgmr.msra.gmra.mxu2 %v442_v22 }
 0x206   :  { %v421_v29 = vpop.permute.xlu1 %420 }
 0x207   :  { %v427_v30 = vadd.f32 %v421_v29, %v411_v27 }
 0x209   :  { %v443_v31 = vadd.f32 %v437_v28, %v427_v30 }
 0x20b   :  { %v391_v34 = vpop.permute.xlu0 %390  ;;  %485 = vmatmul.f32.gmra.mxu2 %v443_v31 }
 0x20c   :  { %v396_v32 = vadd.f32 %v391_v34, %v380_v35 }
 0x20e   :  { %v407_v36 = vpop.permute.xlu1 %406 }
 0x20f   :  { %v412_v37 = vadd.f32 %v407_v36, %v396_v32 }
 0x211   :  { %v428_v38 = vadd.f32 %v423_v33, %v412_v37 }
 0x213   :  { %v439_v39 = vpop.permute.xlu0 %438 }
 0x214   :  { %v444_v1 = vadd.f32 %v439_v39, %v428_v38 }
 0x216   :  { %488 = vmatmul.f32.gmra.mxu2 %v444_v1  ;;  %v393_v41 = vpop.permute.xlu1 %392  ;;  %v725_v1 = vld [vmem:[%s1089_s8] ss:$0 sm:$0xff] }
 0x217   :  { %v397_v42 = vadd.f32 %v393_v41, %v381_v40 }
 0x219   :  { %v413_v44 = vadd.f32 %v409_v43, %v397_v42 }
 0x21b   :  { %v425_v45 = vpop.permute.xlu0 %424 }
 0x21c   :  { %v429_v2 = vadd.f32 %v425_v45, %v413_v44  ;;  %v726_v45 = vld [vmem:[%s1090_s9] ss:$0 sm:$0xff] }
 0x21e   :  { %v441_v46 = vpop.permute.xlu1 %440 }
 0x21f   :  { %v445_v47 = vadd.f32 %v441_v46, %v429_v2 }
 0x221   :  { %491 = vmatmul.f32.gmra.mxu2 %v445_v47 }
 0x284   :  { %v483_v48 = vpop.f32.mrf.mxu2 }
 0x285   :  { %v484_v50 = vadd.f32 %v724_v5, %v483_v48 }
 0x28e   :  { %v486_v49 = vpop.f32.mrf.mxu2 }
 0x28f   :  { %v487_v51 = vadd.f32 %v724_v5, %v486_v49 }
 0x291   :  { %v497_v52 = vadd.f32 %v487_v51, %v484_v50 }
 0x293   :  { %v498_v53 = vrot.slane %v497_v52, 4 }
 0x295   :  { %v499_v54 = vadd.f32 %v498_v53, %v497_v52 }
 0x297   :  { %v500_v55 = vrot.slane %v499_v54, 2 }
 0x299   :  { %v501_v56 = vadd.f32 %v500_v55, %v499_v54  ;;  %v489_v58 = vpop.f32.mrf.mxu2 }
 0x29a   :  { %v490_v4 = vadd.f32 %v724_v5, %v489_v58 }
 0x29b   :  { %v502_v57 = vrot.slane %v501_v56, 1 }
 0x29d   :  { %v503_v6 = vadd.f32 %v502_v57, %v501_v56 }
 0x29f   :  { %v511_v59 = vmul.f32 0.0625, %v503_v6 }
 0x2a1   :  { %v513_v60 = vsub.f32 %v484_v50, %v511_v59  ;;  %v514_v61 = vsub.f32 %v487_v51, %v511_v59 }
 0x2a3   :  { %v517_v62 = vmul.f32 %v513_v60, %v513_v60  ;;  %v518_v63 = vmul.f32 %v514_v61, %v514_v61 }
 0x2a4   :  { %v492_v0 = vpop.f32.mrf.mxu2 }
 0x2a5   :  { %v521_v3 = vadd.f32 %v518_v63, %v517_v62  ;;  %v493_v7 = vadd.f32 %v724_v5, %v492_v0 }
 0x2a7   :  { %v522_v8 = vrot.slane %v521_v3, 4  ;;  %v504_v9 = vadd.f32 %v493_v7, %v490_v4 }
 0x2a9   :  { %v523_v10 = vadd.f32 %v522_v8, %v521_v3  ;;  %v505_v11 = vrot.slane %v504_v9, 4 }
 0x2ab   :  { %v524_v12 = vrot.slane %v523_v10, 2  ;;  %v506_v13 = vadd.f32 %v505_v11, %v504_v9 }
 0x2ad   :  { %v525_v14 = vadd.f32 %v524_v12, %v523_v10  ;;  %v507_v15 = vrot.slane %v506_v13, 2  ;;  %v667_v10 = vpop.f32.mrf.mxu3 }
 0x2af   :  { %v526_v16 = vrot.slane %v525_v14, 1  ;;  %v508_v17 = vadd.f32 %v507_v15, %v506_v13 }
 0x2b1   :  { %v527_v18 = vadd.f32 %v526_v16, %v525_v14  ;;  %v509_v19 = vrot.slane %v508_v17, 1 }
 0x2b3   :  { %v535_v20 = vmul.f32 0.0625, %v527_v18  ;;  %v510_v21 = vadd.f32 %v509_v19, %v508_v17 }
 0x2b5   :  { %v537_v22 = vadd.f32 1e-05, %v535_v20  ;;  %v512_v23 = vmul.f32 0.0625, %v510_v21 }
 0x2b7   :  { %752 = vrsqrt.f32 %v537_v22  ;;  %v515_v24 = vsub.f32 %v490_v4, %v512_v23  ;;  %v516_v25 = vsub.f32 %v493_v7, %v512_v23  ;;  %vm545_vm10 = vweird.f32 %v537_v22 }
 0x2b9   :  { %v519_v26 = vmul.f32 %v515_v24, %v515_v24  ;;  %v520_v27 = vmul.f32 %v516_v25, %v516_v25 }
 0x2bb   :  { %v528_v28 = vadd.f32 %v520_v27, %v519_v26  ;;  %v670_v26 = vpop.f32.mrf.mxu3 }
 0x2bd   :  { %v753_v29 = vpop.eup %752  ;;  %v529_v30 = vrot.slane %v528_v28, 4 }
 0x2be   :  { %v540_v31 = vmul.f32 %v753_v29, %v537_v22  ;;  %vm546_vm9 = vweird.f32 %v753_v29 }
 0x2bf   :  { %v530_v34 = vadd.f32 %v529_v30, %v528_v28  ;;  %vm547_vm11 = vmor %vm545_vm10, %vm546_vm9 }
 0x2c0   :  { %v541_v35 = vmul.f32 %v753_v29, %v540_v31 }
 0x2c1   :  { %v531_v32 = vrot.slane %v530_v34, 2 }
 0x2c2   :  { %v542_v33 = vmul.f32 0.5, %v541_v35 }
 0x2c3   :  { %v532_v36 = vadd.f32 %v531_v32, %v530_v34 }
 0x2c4   :  { %v543_v37 = vsub.f32 1.5, %v542_v33 }
 0x2c5   :  { %v533_v38 = vrot.slane %v532_v36, 1 }
 0x2c6   :  { %v544_v39 = vmul.f32 %v753_v29, %v543_v37 }
 0x2c7   :  { %v534_v40 = vadd.f32 %v533_v38, %v532_v36 }
 0x2c8   :  { %v548_v41 = vsel %vm547_vm11, %v753_v29, %v544_v39 }
 0x2c9   :  { %v559_v42 = vmul.f32 %v548_v41, %v513_v60  ;;  %v560_v43 = vmul.f32 %v548_v41, %v514_v61  ;;  %v536_v44 = vmul.f32 0.0625, %v534_v40 }
 0x2cb   :  { %v567_v2 = vmul.f32 %v725_v1, %v560_v43  ;;  %v538_v46 = vadd.f32 1e-05, %v536_v44  ;;  %v566_v47 = vmul.f32 %v725_v1, %v559_v42  ;;  %v673_v43 = vpop.f32.mrf.mxu3 }
 0x2cd   :  { %754 = vrsqrt.f32 %v538_v46  ;;  %v573_v48 = vadd.f32 %v726_v45, %v566_v47  ;;  %v574_v5 = vadd.f32 %v726_v45, %v567_v2  ;;  %vm555_vm13 = vweird.f32 %v538_v46 }
 0x2cf   :  { %v577_v49 = vmin.f32 %v573_v48, 20.0  ;;  %v578_v50 = vmin.f32 %v574_v5, 20.0 }
 0x2d1   :  { %v581_v51 = vmul.f32 1.442695, %v577_v49  ;;  %v583_v52 = vmul.f32 1.442695, %v578_v50 }
 0x2d3   :  { %v755_v53 = vpop.eup %754  ;;  %756 = vpow2.f32 %v581_v51  ;;  %v676_v49 = vpop.f32.mrf.mxu3 }
 0x2d4   :  { %v550_v54 = vmul.f32 %v755_v53, %v538_v46  ;;  %758 = vpow2.f32 %v583_v52  ;;  %vm556_vm12 = vweird.f32 %v755_v53 }
 0x2d5   :  { %vm557_vm14 = vmor %vm555_vm13, %vm556_vm12 }
 0x2d6   :  { %v551_v55 = vmul.f32 %v755_v53, %v550_v54 }
 0x2d8   :  { %v552_v56 = vmul.f32 0.5, %v551_v55 }
 0x2d9   :  { %v757_v57 = vpop.eup %756 }
 0x2da   :  { %v759_v58 = vpop.eup %758  ;;  %v553_v6 = vsub.f32 1.5, %v552_v56  ;;  %v589_v59 = vadd.f32 2.0, %v757_v57 }
 0x2db   :  { %v590_v60 = vadd.f32 2.0, %v759_v58 }
 0x2dc   :  { %v554_v61 = vmul.f32 %v755_v53, %v553_v6  ;;  %v593_v62 = vmul.f32 %v757_v57, %v589_v59 }
 0x2dd   :  { %v594_v63 = vmul.f32 %v759_v58, %v590_v60 }
 0x2de   :  { %v558_v0 = vsel %vm557_vm14, %v755_v53, %v554_v61  ;;  %v597_v3 = vadd.f32 2.0, %v593_v62 }
 0x2df   :  { %v561_v4 = vmul.f32 %v558_v0, %v515_v24  ;;  %v562_v7 = vmul.f32 %v558_v0, %v516_v25  ;;  %v598_v8 = vadd.f32 2.0, %v594_v63  ;;  %v727_v25 = vld [vmem:[%s1091_s13] ss:$0 sm:$0xff] }
 0x2e0   :  { %760 = vrcp.f32 %v597_v3  ;;  %v671_v30 = vadd.f32 %v727_v25, %v670_v26  ;;  %v668_v35 = vadd.f32 %v727_v25, %v667_v10  ;;  %v677_v53 = vadd.f32 %v727_v25, %v676_v49 }
 0x2e1   :  { %v569_v9 = vmul.f32 %v725_v1, %v562_v7  ;;  %762 = vrcp.f32 %v598_v8  ;;  %v568_v11 = vmul.f32 %v725_v1, %v561_v4  ;;  %v674_v55 = vadd.f32 %v727_v25, %v673_v43 }
 0x2e3   :  { %v575_v12 = vadd.f32 %v726_v45, %v568_v11  ;;  %v576_v13 = vadd.f32 %v726_v45, %v569_v9 }
 0x2e5   :  { %v579_v14 = vmin.f32 %v575_v12, 20.0  ;;  %v580_v15 = vmin.f32 %v576_v13, 20.0 }
 0x2e6   :  { %v761_v16 = vpop.eup %760 }
 0x2e7   :  { %v763_v17 = vpop.eup %762  ;;  %v605_v18 = vmul.f32 %v761_v16, %v597_v3  ;;  %v585_v19 = vmul.f32 1.442695, %v579_v14  ;;  %v587_v20 = vmul.f32 1.442695, %v580_v15 }
 0x2e8   :  { %v606_v21 = vmul.f32 %v763_v17, %v598_v8 }
 0x2e9   :  { %v609_v22 = vsub.f32 2.0, %v605_v18  ;;  %764 = vpow2.f32 %v585_v19 }
 0x2ea   :  { %v610_v23 = vsub.f32 2.0, %v606_v21  ;;  %766 = vpow2.f32 %v587_v20 }
 0x2eb   :  { %v613_v24 = vmul.f32 %v761_v16, %v609_v22 }
 0x2ec   :  { %v614_v27 = vmul.f32 %v763_v17, %v610_v23 }
 0x2ed   :  { %v617_v28 = vmul.f32 %v613_v24, %v593_v62 }
 0x2ee   :  { %v618_v29 = vmul.f32 %v614_v27, %v594_v63 }
 0x2ef   :  { %v765_v31 = vpop.eup %764  ;;  %v621_v34 = vmul.f32 %v617_v28, %v573_v48 }
 0x2f0   :  { %v767_v32 = vpop.eup %766  ;;  %v622_v33 = vmul.f32 %v618_v29, %v574_v5  ;;  %v591_v36 = vadd.f32 2.0, %v765_v31 }
 0x2f1   :  { %v679_v37 = vadd.f32 %v668_v35, %v621_v34  ;;  %v592_v38 = vadd.f32 2.0, %v767_v32 }
 0x2f2   :  { %v680_v39 = vadd.f32 %v671_v30, %v622_v33  ;;  %v595_v1 = vmul.f32 %v765_v31, %v591_v36 }
 0x2f3   :  { %683 = vst [vmem:[%s1092_s16] sm:$0xff] %v679_v37  ;;  %v596_v40 = vmul.f32 %v767_v32, %v592_v38 }
 0x2f4   :  { %684 = vst [vmem:[%s1092_s16 + $0x8] sm:$0xff] %v680_v39  ;;  %v599_v41 = vadd.f32 2.0, %v595_v1 }
 0x2f5   :  { %v600_v42 = vadd.f32 2.0, %v596_v40 }
 0x2f6   :  { %768 = vrcp.f32 %v599_v41 }
 0x2f7   :  { %770 = vrcp.f32 %v600_v42 }
 0x2fc   :  { %v769_v44 = vpop.eup %768 }
 0x2fd   :  { %v771_v45 = vpop.eup %770  ;;  %v607_v2 = vmul.f32 %v769_v44, %v599_v41 }
 0x2fe   :  { %v608_v46 = vmul.f32 %v771_v45, %v600_v42 }
 0x2ff   :  { %v611_v47 = vsub.f32 2.0, %v607_v2 }
 0x300   :  { %v612_v48 = vsub.f32 2.0, %v608_v46 }
 0x301   :  { %v615_v5 = vmul.f32 %v769_v44, %v611_v47 }
 0x302   :  { %v616_v50 = vmul.f32 %v771_v45, %v612_v48 }
 0x303   :  { %v619_v51 = vmul.f32 %v615_v5, %v595_v1 }
 0x304   :  { %v620_v52 = vmul.f32 %v616_v50, %v596_v40 }
 0x305   :  { %v623_v54 = vmul.f32 %v619_v51, %v575_v12 }
 0x306   :  { %v624_v56 = vmul.f32 %v620_v52, %v576_v13 }
 0x307   :  { %v681_v57 = vadd.f32 %v674_v55, %v623_v54 }
 0x308   :  { %v682_v58 = vadd.f32 %v677_v53, %v624_v56 }
 0x309   :  { %685 = vst [vmem:[%s1092_s16 + $0x10] sm:$0xff] %v681_v57 }
 0x30a   :  { %686 = vst [vmem:[%s1092_s16 + $0x18] sm:$0xff] %v682_v58 }

</bundles_post_ra>
